<compile_context>
chip_gen: v7x
topology: tpu7x:2x2x1
jax: 0.10.0
libtpu: 0.0.40
codegen_flags: <defaults>
</compile_context>

<pallas_src>
import jax
import jax.numpy as jnp
from jax.experimental import pallas as pl
from jax.experimental.pallas import tpu as pltpu  # noqa: F401  (TPU backend)

BN_EPS = 1e-3
LANE = 128


def _round_up(n, m):
    return ((n + m - 1) // m) * m


def _make_fused_kernel(nb, dout1, slab_offsets):
    """nb BN blocks.  dout1 = padded width of block-1 output.
    slab_offsets = nb static tuples (row_off, din_pad, dout_pad) describing the
    w_slab layout for blocks 2..nb followed by the classifier."""

    def kernel(x_ref, w1_ref, ws_ref, vec_ref, o_ref):
        n = x_ref.shape[0]
        inv_n = 1.0 / n

        def bn_relu(y, i, dout):
            # BatchNorm1d with current-batch (biased) stats, folded into a
            # single scale+shift.  gamma row i, beta row nb+i of vec slab.
            g = vec_ref[i:i + 1, :dout]
            b = vec_ref[nb + i:nb + i + 1, :dout]
            mean = jnp.sum(y, axis=0, keepdims=True) * inv_n
            var = jnp.sum(y * y, axis=0, keepdims=True) * inv_n - mean * mean
            s = g * jax.lax.rsqrt(var + BN_EPS)
            return jnp.maximum(y * s + (b - mean * s), 0.0)

        # Block 1 (its weight is the wide [in_pad, 256] slab, kept separate).
        h = bn_relu(
            jnp.dot(x_ref[...].astype(jnp.bfloat16), w1_ref[...],
                    preferred_element_type=jnp.float32),
            0, dout1)

        # Blocks 2..nb: static (zero-cost) views into the packed weight slab.
        for j, (off, din, dout) in enumerate(slab_offsets[:-1]):
            w = ws_ref[off:off + din, :dout]
            h = bn_relu(
                jnp.dot(h.astype(jnp.bfloat16), w,
                        preferred_element_type=jnp.float32),
                j + 1, dout)

        # Classifier (lane-dense padded output) + bias (vec row 2*nb).
        off, din, dout = slab_offsets[-1]
        yc = jnp.dot(h.astype(jnp.bfloat16), ws_ref[off:off + din, :dout],
                     preferred_element_type=jnp.float32)
        o_ref[...] = (yc + vec_ref[2 * nb:2 * nb + 1, :dout]).astype(o_ref.dtype)

    return kernel


def fused_mlp_forward(x2d, w1, w_slab, vec, meta):
    """x2d: [N, in_pad] f32.  Returns [N, out_pad] f32 (caller slices logits)."""
    N = x2d.shape[0]
    out_pad = meta["out_pad"]
    kernel = _make_fused_kernel(meta["nb"], meta["dout1"], meta["slab_offsets"])

    flops = 2 * N * (x2d.shape[1] * meta["dout1"]
                     + sum(din * dout for _, din, dout in meta["slab_offsets"]))
    transcendentals = meta["dout1"] + sum(d for _, _, d in meta["slab_offsets"][:-1])
    bytes_accessed = (x2d.size * x2d.dtype.itemsize
                      + w1.size * w1.dtype.itemsize
                      + w_slab.size * w_slab.dtype.itemsize
                      + vec.size * vec.dtype.itemsize
                      + N * out_pad * 4)

    # No grid: one invocation, full arrays single-buffered in VMEM (~0.7 MiB).
    return pl.pallas_call(
        kernel,
        out_shape=jax.ShapeDtypeStruct((N, out_pad), jnp.float32),
        cost_estimate=pl.CostEstimate(
            flops=int(flops),
            transcendentals=int(transcendentals),
            bytes_accessed=int(bytes_accessed)),
    )(x2d, w1, w_slab, vec)


def init_mlp_params(key, input_size, output_size, sizes=(256, 128, 64, 64)):
    """fc_init_-style init: truncated-normal(std=0.01) weights, zero biases;
    BN affine gamma=1, beta=0.  Weights pre-transposed [Din, Dout], zero-padded
    to lane multiples, stored bf16 (MXU operands; cast hoisted out of the
    per-call path).  BN-block linear biases are omitted (zero at init AND
    exactly cancelled by the BN batch-mean subtraction)."""
    nb = len(sizes)
    real = [input_size] + list(sizes)
    padded = [_round_up(d, LANE) for d in real]
    out_pad = _round_up(output_size, LANE)

    def trunc(k, shape):
        return 0.01 * jax.random.truncated_normal(k, -2.0, 2.0, shape, jnp.float32)

    keys = jax.random.split(key, nb + 1)
    w_padded = []
    for i in range(nb):
        w = trunc(keys[i], (real[i], real[i + 1]))
        wp = (jnp.zeros((padded[i], padded[i + 1]), jnp.float32)
              .at[:real[i], :real[i + 1]].set(w))
        w_padded.append(wp)
    wc = trunc(keys[nb], (real[-1], output_size))
    wc_p = (jnp.zeros((padded[-1], out_pad), jnp.float32)
            .at[:real[-1], :output_size].set(wc))

    # Pack: w1 alone (widest Dout); blocks 2..nb + classifier row-concatenated
    # into one bf16 slab -> 2 weight DMAs total.
    slab_w = max([padded[i + 1] for i in range(1, nb)] + [out_pad])
    blocks, offsets, off = [], [], 0
    for i in range(1, nb):
        blocks.append(jnp.zeros((padded[i], slab_w), jnp.float32)
                      .at[:, :padded[i + 1]].set(w_padded[i]))
        offsets.append((off, padded[i], padded[i + 1]))
        off += padded[i]
    blocks.append(jnp.zeros((padded[nb], slab_w), jnp.float32)
                  .at[:, :out_pad].set(wc_p))
    offsets.append((off, padded[nb], out_pad))

    w1 = w_padded[0].astype(jnp.bfloat16)
    w_slab = jnp.concatenate(blocks, axis=0).astype(jnp.bfloat16)

    # Pack gamma (rows 0..nb-1), beta (rows nb..2nb-1) and classifier bias
    # (row 2nb) into one padded f32 slab -> 1 small DMA instead of 9.
    vec_w = max(padded[1:] + [out_pad])
    vec = jnp.zeros((_round_up(2 * nb + 1, 8), vec_w), jnp.float32)
    for i in range(nb):
        vec = vec.at[i, :sizes[i]].set(1.0)   # gamma = 1 on real features
    # beta rows and classifier-bias row are zero (PyTorch init).

    meta = dict(nb=nb, in_pad=padded[0], dout1=padded[1],
                slab_offsets=tuple(offsets), out_pad=out_pad,
                output_size=output_size)
    return (w1, w_slab, vec), meta


def mlp_forward(params, meta, x_nchw):
    w1, w_slab, vec = params
    n = x_nchw.shape[0]
    x = x_nchw.reshape(n, -1).astype(jnp.float32)        # l2l.nn.Flatten
    if x.shape[1] != meta["in_pad"]:
        x = jnp.pad(x, ((0, 0), (0, meta["in_pad"] - x.shape[1])))
    out_pad = fused_mlp_forward(x, w1, w_slab, vec, meta)
    return out_pad[:, :meta["output_size"]]


if __name__ == "__main__":
    key = jax.random.PRNGKey(0)
    kx, kp = jax.random.split(key)

    N, C, H, W = 2, 4, 16, 16          # input_size = C*H*W = 1024
    OUTPUT_SIZE = 16
    x = jax.random.normal(kx, (N, C, H, W), dtype=jnp.float32)

    params, meta = init_mlp_params(kp, input_size=C * H * W,
                                   output_size=OUTPUT_SIZE)

    out = mlp_forward(params, meta, x)
    out = jax.block_until_ready(out)
    assert out.shape == (N, OUTPUT_SIZE)
    assert bool(jnp.all(jnp.isfinite(out)))
    print("KERNEL_OK")
</pallas_src>

<mosaic_0001>
module attributes {stable_mosaic.version = 11 : i64} {
  func.func @kernel(%arg0: memref<2x1024xf32, #tpu.memory_space<vmem>>, %arg1: memref<1024x256xbf16, #tpu.memory_space<vmem>>, %arg2: memref<640x128xbf16, #tpu.memory_space<vmem>>, %arg3: memref<16x256xf32, #tpu.memory_space<vmem>>, %arg4: memref<2x128xf32, #tpu.memory_space<vmem>>) attributes {dimension_semantics = [], scalar_prefetch = 0 : i64, scratch_operands = 0 : i64, tpu.core_type = #tpu.core_type<tc>} {
    %c0 = arith.constant 0 : index
    %c0_0 = arith.constant 0 : index
    %0 = vector.load %arg0[%c0, %c0_0] : memref<2x1024xf32, #tpu.memory_space<vmem>>, vector<2x1024xf32>
    %1 = arith.truncf %0 : vector<2x1024xf32> to vector<2x1024xbf16>
    %c0_1 = arith.constant 0 : index
    %c0_2 = arith.constant 0 : index
    %2 = vector.load %arg1[%c0_1, %c0_2] : memref<1024x256xbf16, #tpu.memory_space<vmem>>, vector<1024x256xbf16>
    %cst = arith.constant dense<0.000000e+00> : vector<2x256xf32>
    %3 = tpu.matmul %1, %2, %cst {dimension_numbers = #tpu.dot_dimension_numbers<[1], [0], [0], [1], [0, 0, 1, 1], [], []>} : vector<2x1024xbf16>, vector<1024x256xbf16>, vector<2x256xf32> -> vector<2x256xf32>
    %c0_3 = arith.constant 0 : index
    %c0_4 = arith.constant 0 : index
    %4 = vector.load %arg3[%c0_3, %c0_4] : memref<16x256xf32, #tpu.memory_space<vmem>>, vector<1x256xf32>
    %c4 = arith.constant 4 : index
    %c0_5 = arith.constant 0 : index
    %5 = vector.load %arg3[%c4, %c0_5] : memref<16x256xf32, #tpu.memory_space<vmem>>, vector<1x256xf32>
    %cst_6 = arith.constant dense<0.000000e+00> : vector<256xf32>
    %6 = vector.multi_reduction <add>, %3, %cst_6 [0] : vector<2x256xf32> to vector<256xf32>
    %7 = vector.shape_cast %6 : vector<256xf32> to vector<1x256xf32>
    %cst_7 = arith.constant 5.000000e-01 : f32
    %8 = vector.broadcast %cst_7 : f32 to vector<1x256xf32>
    %9 = arith.mulf %7, %8 : vector<1x256xf32>
    %10 = arith.mulf %3, %3 : vector<2x256xf32>
    %cst_8 = arith.constant dense<0.000000e+00> : vector<256xf32>
    %11 = vector.multi_reduction <add>, %10, %cst_8 [0] : vector<2x256xf32> to vector<256xf32>
    %12 = vector.shape_cast %11 : vector<256xf32> to vector<1x256xf32>
    %cst_9 = arith.constant 5.000000e-01 : f32
    %13 = vector.broadcast %cst_9 : f32 to vector<1x256xf32>
    %14 = arith.mulf %12, %13 : vector<1x256xf32>
    %15 = arith.mulf %9, %9 : vector<1x256xf32>
    %16 = arith.subf %14, %15 : vector<1x256xf32>
    %cst_10 = arith.constant 1.000000e-03 : f32
    %17 = vector.broadcast %cst_10 : f32 to vector<1x256xf32>
    %18 = arith.addf %16, %17 : vector<1x256xf32>
    %19 = math.rsqrt %18 : vector<1x256xf32>
    %20 = arith.mulf %4, %19 : vector<1x256xf32>
    %21 = vector.broadcast %20 : vector<1x256xf32> to vector<2x256xf32>
    %22 = arith.mulf %3, %21 : vector<2x256xf32>
    %23 = arith.mulf %9, %20 : vector<1x256xf32>
    %24 = arith.subf %5, %23 : vector<1x256xf32>
    %25 = vector.broadcast %24 : vector<1x256xf32> to vector<2x256xf32>
    %26 = arith.addf %22, %25 : vector<2x256xf32>
    %cst_11 = arith.constant 0.000000e+00 : f32
    %27 = vector.broadcast %cst_11 : f32 to vector<2x256xf32>
    %28 = arith.maximumf %26, %27 : vector<2x256xf32>
    %c0_12 = arith.constant 0 : index
    %c0_13 = arith.constant 0 : index
    %29 = vector.load %arg2[%c0_12, %c0_13] : memref<640x128xbf16, #tpu.memory_space<vmem>>, vector<256x128xbf16>
    %30 = arith.truncf %28 : vector<2x256xf32> to vector<2x256xbf16>
    %cst_14 = arith.constant dense<0.000000e+00> : vector<2x128xf32>
    %31 = tpu.matmul %30, %29, %cst_14 {dimension_numbers = #tpu.dot_dimension_numbers<[1], [0], [0], [1], [0, 0, 1, 1], [], []>} : vector<2x256xbf16>, vector<256x128xbf16>, vector<2x128xf32> -> vector<2x128xf32>
    %c1 = arith.constant 1 : index
    %c0_15 = arith.constant 0 : index
    %32 = vector.load %arg3[%c1, %c0_15] : memref<16x256xf32, #tpu.memory_space<vmem>>, vector<1x128xf32>
    %c5 = arith.constant 5 : index
    %c0_16 = arith.constant 0 : index
    %33 = vector.load %arg3[%c5, %c0_16] : memref<16x256xf32, #tpu.memory_space<vmem>>, vector<1x128xf32>
    %cst_17 = arith.constant dense<0.000000e+00> : vector<128xf32>
    %34 = vector.multi_reduction <add>, %31, %cst_17 [0] : vector<2x128xf32> to vector<128xf32>
    %35 = vector.shape_cast %34 : vector<128xf32> to vector<1x128xf32>
    %cst_18 = arith.constant 5.000000e-01 : f32
    %36 = vector.broadcast %cst_18 : f32 to vector<1x128xf32>
    %37 = arith.mulf %35, %36 : vector<1x128xf32>
    %38 = arith.mulf %31, %31 : vector<2x128xf32>
    %cst_19 = arith.constant dense<0.000000e+00> : vector<128xf32>
    %39 = vector.multi_reduction <add>, %38, %cst_19 [0] : vector<2x128xf32> to vector<128xf32>
    %40 = vector.shape_cast %39 : vector<128xf32> to vector<1x128xf32>
    %cst_20 = arith.constant 5.000000e-01 : f32
    %41 = vector.broadcast %cst_20 : f32 to vector<1x128xf32>
    %42 = arith.mulf %40, %41 : vector<1x128xf32>
    %43 = arith.mulf %37, %37 : vector<1x128xf32>
    %44 = arith.subf %42, %43 : vector<1x128xf32>
    %cst_21 = arith.constant 1.000000e-03 : f32
    %45 = vector.broadcast %cst_21 : f32 to vector<1x128xf32>
    %46 = arith.addf %44, %45 : vector<1x128xf32>
    %47 = math.rsqrt %46 : vector<1x128xf32>
    %48 = arith.mulf %32, %47 : vector<1x128xf32>
    %49 = vector.broadcast %48 : vector<1x128xf32> to vector<2x128xf32>
    %50 = arith.mulf %31, %49 : vector<2x128xf32>
    %51 = arith.mulf %37, %48 : vector<1x128xf32>
    %52 = arith.subf %33, %51 : vector<1x128xf32>
    %53 = vector.broadcast %52 : vector<1x128xf32> to vector<2x128xf32>
    %54 = arith.addf %50, %53 : vector<2x128xf32>
    %cst_22 = arith.constant 0.000000e+00 : f32
    %55 = vector.broadcast %cst_22 : f32 to vector<2x128xf32>
    %56 = arith.maximumf %54, %55 : vector<2x128xf32>
    %c256 = arith.constant 256 : index
    %c0_23 = arith.constant 0 : index
    %57 = vector.load %arg2[%c256, %c0_23] : memref<640x128xbf16, #tpu.memory_space<vmem>>, vector<128x128xbf16>
    %58 = arith.truncf %56 : vector<2x128xf32> to vector<2x128xbf16>
    %cst_24 = arith.constant dense<0.000000e+00> : vector<2x128xf32>
    %59 = tpu.matmul %58, %57, %cst_24 {dimension_numbers = #tpu.dot_dimension_numbers<[1], [0], [0], [1], [0, 0, 1, 1], [], []>} : vector<2x128xbf16>, vector<128x128xbf16>, vector<2x128xf32> -> vector<2x128xf32>
    %c2 = arith.constant 2 : index
    %c0_25 = arith.constant 0 : index
    %60 = vector.load %arg3[%c2, %c0_25] : memref<16x256xf32, #tpu.memory_space<vmem>>, vector<1x128xf32>
    %c6 = arith.constant 6 : index
    %c0_26 = arith.constant 0 : index
    %61 = vector.load %arg3[%c6, %c0_26] : memref<16x256xf32, #tpu.memory_space<vmem>>, vector<1x128xf32>
    %cst_27 = arith.constant dense<0.000000e+00> : vector<128xf32>
    %62 = vector.multi_reduction <add>, %59, %cst_27 [0] : vector<2x128xf32> to vector<128xf32>
    %63 = vector.shape_cast %62 : vector<128xf32> to vector<1x128xf32>
    %cst_28 = arith.constant 5.000000e-01 : f32
    %64 = vector.broadcast %cst_28 : f32 to vector<1x128xf32>
    %65 = arith.mulf %63, %64 : vector<1x128xf32>
    %66 = arith.mulf %59, %59 : vector<2x128xf32>
    %cst_29 = arith.constant dense<0.000000e+00> : vector<128xf32>
    %67 = vector.multi_reduction <add>, %66, %cst_29 [0] : vector<2x128xf32> to vector<128xf32>
    %68 = vector.shape_cast %67 : vector<128xf32> to vector<1x128xf32>
    %cst_30 = arith.constant 5.000000e-01 : f32
    %69 = vector.broadcast %cst_30 : f32 to vector<1x128xf32>
    %70 = arith.mulf %68, %69 : vector<1x128xf32>
    %71 = arith.mulf %65, %65 : vector<1x128xf32>
    %72 = arith.subf %70, %71 : vector<1x128xf32>
    %cst_31 = arith.constant 1.000000e-03 : f32
    %73 = vector.broadcast %cst_31 : f32 to vector<1x128xf32>
    %74 = arith.addf %72, %73 : vector<1x128xf32>
    %75 = math.rsqrt %74 : vector<1x128xf32>
    %76 = arith.mulf %60, %75 : vector<1x128xf32>
    %77 = vector.broadcast %76 : vector<1x128xf32> to vector<2x128xf32>
    %78 = arith.mulf %59, %77 : vector<2x128xf32>
    %79 = arith.mulf %65, %76 : vector<1x128xf32>
    %80 = arith.subf %61, %79 : vector<1x128xf32>
    %81 = vector.broadcast %80 : vector<1x128xf32> to vector<2x128xf32>
    %82 = arith.addf %78, %81 : vector<2x128xf32>
    %cst_32 = arith.constant 0.000000e+00 : f32
    %83 = vector.broadcast %cst_32 : f32 to vector<2x128xf32>
    %84 = arith.maximumf %82, %83 : vector<2x128xf32>
    %c384 = arith.constant 384 : index
    %c0_33 = arith.constant 0 : index
    %85 = vector.load %arg2[%c384, %c0_33] : memref<640x128xbf16, #tpu.memory_space<vmem>>, vector<128x128xbf16>
    %86 = arith.truncf %84 : vector<2x128xf32> to vector<2x128xbf16>
    %cst_34 = arith.constant dense<0.000000e+00> : vector<2x128xf32>
    %87 = tpu.matmul %86, %85, %cst_34 {dimension_numbers = #tpu.dot_dimension_numbers<[1], [0], [0], [1], [0, 0, 1, 1], [], []>} : vector<2x128xbf16>, vector<128x128xbf16>, vector<2x128xf32> -> vector<2x128xf32>
    %c3 = arith.constant 3 : index
    %c0_35 = arith.constant 0 : index
    %88 = vector.load %arg3[%c3, %c0_35] : memref<16x256xf32, #tpu.memory_space<vmem>>, vector<1x128xf32>
    %c7 = arith.constant 7 : index
    %c0_36 = arith.constant 0 : index
    %89 = vector.load %arg3[%c7, %c0_36] : memref<16x256xf32, #tpu.memory_space<vmem>>, vector<1x128xf32>
    %cst_37 = arith.constant dense<0.000000e+00> : vector<128xf32>
    %90 = vector.multi_reduction <add>, %87, %cst_37 [0] : vector<2x128xf32> to vector<128xf32>
    %91 = vector.shape_cast %90 : vector<128xf32> to vector<1x128xf32>
    %cst_38 = arith.constant 5.000000e-01 : f32
    %92 = vector.broadcast %cst_38 : f32 to vector<1x128xf32>
    %93 = arith.mulf %91, %92 : vector<1x128xf32>
    %94 = arith.mulf %87, %87 : vector<2x128xf32>
    %cst_39 = arith.constant dense<0.000000e+00> : vector<128xf32>
    %95 = vector.multi_reduction <add>, %94, %cst_39 [0] : vector<2x128xf32> to vector<128xf32>
    %96 = vector.shape_cast %95 : vector<128xf32> to vector<1x128xf32>
    %cst_40 = arith.constant 5.000000e-01 : f32
    %97 = vector.broadcast %cst_40 : f32 to vector<1x128xf32>
    %98 = arith.mulf %96, %97 : vector<1x128xf32>
    %99 = arith.mulf %93, %93 : vector<1x128xf32>
    %100 = arith.subf %98, %99 : vector<1x128xf32>
    %cst_41 = arith.constant 1.000000e-03 : f32
    %101 = vector.broadcast %cst_41 : f32 to vector<1x128xf32>
    %102 = arith.addf %100, %101 : vector<1x128xf32>
    %103 = math.rsqrt %102 : vector<1x128xf32>
    %104 = arith.mulf %88, %103 : vector<1x128xf32>
    %105 = vector.broadcast %104 : vector<1x128xf32> to vector<2x128xf32>
    %106 = arith.mulf %87, %105 : vector<2x128xf32>
    %107 = arith.mulf %93, %104 : vector<1x128xf32>
    %108 = arith.subf %89, %107 : vector<1x128xf32>
    %109 = vector.broadcast %108 : vector<1x128xf32> to vector<2x128xf32>
    %110 = arith.addf %106, %109 : vector<2x128xf32>
    %cst_42 = arith.constant 0.000000e+00 : f32
    %111 = vector.broadcast %cst_42 : f32 to vector<2x128xf32>
    %112 = arith.maximumf %110, %111 : vector<2x128xf32>
    %113 = arith.truncf %112 : vector<2x128xf32> to vector<2x128xbf16>
    %c512 = arith.constant 512 : index
    %c0_43 = arith.constant 0 : index
    %114 = vector.load %arg2[%c512, %c0_43] : memref<640x128xbf16, #tpu.memory_space<vmem>>, vector<128x128xbf16>
    %cst_44 = arith.constant dense<0.000000e+00> : vector<2x128xf32>
    %115 = tpu.matmul %113, %114, %cst_44 {dimension_numbers = #tpu.dot_dimension_numbers<[1], [0], [0], [1], [0, 0, 1, 1], [], []>} : vector<2x128xbf16>, vector<128x128xbf16>, vector<2x128xf32> -> vector<2x128xf32>
    %c8 = arith.constant 8 : index
    %c0_45 = arith.constant 0 : index
    %116 = vector.load %arg3[%c8, %c0_45] : memref<16x256xf32, #tpu.memory_space<vmem>>, vector<1x128xf32>
    %117 = vector.broadcast %116 : vector<1x128xf32> to vector<2x128xf32>
    %118 = arith.addf %115, %117 : vector<2x128xf32>
    %c0_46 = arith.constant 0 : index
    %c0_47 = arith.constant 0 : index
    %119 = vector.load %arg4[%c0_46, %c0_47] : memref<2x128xf32, #tpu.memory_space<vmem>>, vector<2x128xf32>
    tpu.vector_store %arg4[%c0_46, %c0_47], %118 {strides = array<i32>} : memref<2x128xf32, #tpu.memory_space<vmem>>, vector<2x128xf32>,
    return
  }
}

</mosaic_0001>

<bundles_post_ra>
// kernel: tpu_custom_call.1
= control target key start
LH: loop header
LB: loop body
LE: loop exit
PB: predicated region body
PF: predicated region fallthrough
CT: control target
= control target key end

     0   :  { %9 = vsyncpa [#allocation3], 0  ;;  %s2614_s0 = inlined_call_operand.hbm [shape: f32[2,1024], index: 0, kind: input, shape index: {}]   ;;  %s2615_s1 = inlined_call_operand.hbm [shape: bf16[1024,256], index: 1, kind: input, shape index: {}]   ;;  %s2616_s2 = inlined_call_operand.hbm [shape: bf16[640,128], index: 2, kind: input, shape index: {}]   ;;  %s2617_s3 = inlined_call_operand.hbm [shape: f32[16,256], index: 3, kind: input, shape index: {}]   ;;  %s2618_s4 = inlined_call_operand.hbm [shape: f32[2,128], index: 4, kind: output, shape index: {}]  }
   0x1   :  { %10 = vsyncpa [#allocation6], 0 }
   0x2   :  { %11 = vsyncpa [#allocation9], 0 }
   0x3   :  { %12 = vsyncpa [#allocation4], 0  ;;  %s2427_s15 = smov [#allocation5]   ;;  %s2309_s19 = scalar_lea.hbm %s2615_s1, 16384 }
   0x4   :  { %s28_s16 = sshll.u32 %s2427_s15, 4  ;;  %p2310_p0 = scmp.ne.s32.totalorder %s2615_s1, %s2309_s19  ;;  %s29_s16 = int_to_ptr.vmem [resolvable:$true] %s28_s16 }
   0x5   :  { %p2313_p1 = scmp.lt.u32.totalorder %s2309_s19, %s2615_s1 }
   0x7   :  { %p2315_p2 = pnand %p2313_p1, %p2310_p0 }
   0x9   :  { %2318 = shalt.err (!%p2315_p2)
}
   0xa   :  { %s2319_s24 = scalar_lea.vmem %s29_s16, 16384  ;;  %p2324_p4 = scmp.lt.s32.totalorder %s29_s16, %s29_s16 }
   0xb   :  { %p2320_p3 = scmp.ne.s32.totalorder %s29_s16, %s2319_s24  ;;  %p2325_p5 = scmp.lt.s32.totalorder %s2319_s24, %s2319_s24 }
   0xd   :  { %p2326_p6 = por %p2325_p5, %p2324_p4 }
   0xf   :  { %p2327_p7 = pnand %p2326_p6, %p2320_p3 }
  0x11   :  { %2330 = shalt.err (!%p2327_p7)
}
  0x12   :  { %s2428_s25 = smov 128   ;;  %s2429_s26 = smov 8  }
  0x13   :  { %34 = dma.hbm_to_vmem [thread:$0]  %s2615_s1, 16384, %s29_s16, [#allocation6], %s2428_s25, %s2428_s25, %s2429_s26  }
  0x14   :  { %s2430_s29 = smov [#allocation2]   ;;  %s2431_s5 = smov [#allocation7]  }
  0x15   :  { %s19_s30 = sshll.u32 %s2430_s29, 4  ;;  %s40_s6 = sshll.u32 %s2431_s5, 4  ;;  %s20_s30 = int_to_ptr.vmem [resolvable:$true] %s19_s30  ;;  %s41_s6 = int_to_ptr.vmem [resolvable:$true] %s40_s6 }
  0x16   :  { %s2331_s9 = scalar_lea.hbm %s2614_s0, 256 }
  0x17   :  { %p2332_p8 = scmp.ne.s32.totalorder %s2614_s0, %s2331_s9  ;;  %p2335_p9 = scmp.lt.u32.totalorder %s2331_s9, %s2614_s0 }
  0x19   :  { %p2337_p10 = pnand %p2335_p9, %p2332_p8 }
  0x1b   :  { %2340 = shalt.err (!%p2337_p10)
}
  0x1c   :  { %s2341_s1 = scalar_lea.vmem %s20_s30, 256  ;;  %p2346_p12 = scmp.lt.s32.totalorder %s20_s30, %s20_s30 }
  0x1d   :  { %p2342_p11 = scmp.ne.s32.totalorder %s20_s30, %s2341_s1  ;;  %p2347_p13 = scmp.lt.s32.totalorder %s2341_s1, %s2341_s1 }
  0x1f   :  { %p2348_p0 = por %p2347_p13, %p2346_p12 }
  0x21   :  { %p2349_p1 = pnand %p2348_p0, %p2342_p11 }
  0x23   :  { %2352 = shalt.err (!%p2349_p1)
}
  0x24   :  { %22 = dma.hbm_to_vmem [thread:$0]  %s2614_s0, 256, %s20_s30, [#allocation3]  }
  0x25   :  { %s2353_s18 = scalar_lea.hbm %s2616_s2, 5120 }
  0x26   :  { %p2354_p2 = scmp.ne.s32.totalorder %s2616_s2, %s2353_s18  ;;  %p2357_p3 = scmp.lt.u32.totalorder %s2353_s18, %s2616_s2 }
  0x28   :  { %p2359_p4 = pnand %p2357_p3, %p2354_p2 }
  0x2a   :  { %2362 = shalt.err (!%p2359_p4)
}
  0x2b   :  { %s2363_s23 = scalar_lea.vmem %s41_s6, 5120  ;;  %p2368_p6 = scmp.lt.s32.totalorder %s41_s6, %s41_s6 }
  0x2c   :  { %p2364_p5 = scmp.ne.s32.totalorder %s41_s6, %s2363_s23  ;;  %p2369_p7 = scmp.lt.s32.totalorder %s2363_s23, %s2363_s23 }
  0x2e   :  { %p2370_p8 = por %p2369_p7, %p2368_p6 }
  0x30   :  { %p2371_p9 = pnand %p2370_p8, %p2364_p5 }
  0x32   :  { %2374 = shalt.err (!%p2371_p9)
}
  0x33   :  { %s2432_s0 = smov 64   ;;  %s2433_s24 = smov 4  }
  0x34   :  { %46 = dma.hbm_to_vmem [thread:$0]  %s2616_s2, 5120, %s41_s6, [#allocation6], %s2432_s0, %s2432_s0, %s2433_s24  }
  0x35   :  { %s2434_s27 = smov [#allocation8]   ;;  %s2375_s5 = scalar_lea.hbm %s2617_s3, 512 }
  0x36   :  { %s52_s28 = sshll.u32 %s2434_s27, 4  ;;  %p2376_p10 = scmp.ne.s32.totalorder %s2617_s3, %s2375_s5  ;;  %s53_s28 = int_to_ptr.vmem [resolvable:$true] %s52_s28 }
  0x37   :  { %p2379_p11 = scmp.lt.u32.totalorder %s2375_s5, %s2617_s3 }
  0x39   :  { %p2381_p12 = pnand %p2379_p11, %p2376_p10 }
  0x3b   :  { %2384 = shalt.err (!%p2381_p12)
}
  0x3c   :  { %s2385_s11 = scalar_lea.vmem %s53_s28, 512  ;;  %p2390_p0 = scmp.lt.s32.totalorder %s53_s28, %s53_s28 }
  0x3d   :  { %p2386_p13 = scmp.ne.s32.totalorder %s53_s28, %s2385_s11  ;;  %p2391_p1 = scmp.lt.s32.totalorder %s2385_s11, %s2385_s11 }
  0x3f   :  { %p2392_p2 = por %p2391_p1, %p2390_p0 }
  0x41   :  { %p2393_p3 = pnand %p2392_p2, %p2386_p13 }
  0x43   :  { %2396 = shalt.err (!%p2393_p3)
}
  0x44   :  { %s2435_s2 = smov 256   ;;  %s2436_s6 = smov 16  }
  0x45   :  { %58 = dma.hbm_to_vmem [thread:$0]  %s2617_s3, 512, %s53_s28, [#allocation9], %s2435_s2, %s2435_s2, %s2436_s6  }
  0x46   :  { %2419 = dma.done.wait [#allocation3], 256  }
  0x47   :  { %2420 = vsyncadd [#allocation3], 4294967040 }
  0x48   :  { %2421 = dma.done.wait [#allocation6], 21504  }
  0x49   :  { %2422 = vsyncadd [#allocation6], 4294945792 }
  0x4a   :  { %2423 = dma.done.wait [#allocation9], 512  }
  0x4b   :  { %2424 = vsyncadd [#allocation9], 4294966784  ;;  %v2065_v0 = vld [vmem:[#allocation5 + $0x104] ss:$8 sps:$4 sm:$0xff]   ;;  %v2067_v1 = vld [vmem:[#allocation5 + $0x100] ss:$8 sps:$4 sm:$0xff]   ;;  %v80_v11 = vlaneseq }
  0x4c   :  { %935 = vmatprep.subr.bf16.mxu0 %v2065_v0  ;;  %v2068_v2 = vld [vmem:[#allocation5 + $0x114] ss:$8 sps:$4 sm:$0xff]   ;;  %v2070_v3 = vld [vmem:[#allocation5 + $0x110] ss:$8 sps:$4 sm:$0xff]   ;;  %v2071_v4 = vld [vmem:[#allocation5 + $0x124] ss:$8 sps:$4 sm:$0xff]  }
  0x4d   :  { %936 = vmatpush1.bf16.msra.mxu0 %v2067_v1  ;;  %v2073_v5 = vld [vmem:[#allocation5 + $0x120] ss:$8 sps:$4 sm:$0xff]   ;;  %v2074_v6 = vld [vmem:[#allocation5 + $0x134] ss:$8 sps:$4 sm:$0xff]   ;;  %v2076_v7 = vld [vmem:[#allocation5 + $0x130] ss:$8 sps:$4 sm:$0xff]  }
  0x4e   :  { %937 = vmatprep.subr.bf16.mxu0 %v2068_v2  ;;  %v2077_v8 = vld [vmem:[#allocation5 + $0x144] ss:$8 sps:$4 sm:$0xff]   ;;  %v2437_v9 = vmov 1983009808   ;;  %v2079_v12 = vld [vmem:[#allocation5 + $0x140] ss:$8 sps:$4 sm:$0xff]  }
  0x4f   :  { %v78_v10 = vunpack.c.l.s4 %v2437_v9  ;;  %v2080_v13 = vld [vmem:[#allocation5 + $0x154] ss:$8 sps:$4 sm:$0xff]   ;;  %v2515_v15 = vshrl.u32 %v80_v11, 7  ;;  %v2082_v16 = vld [vmem:[#allocation5 + $0x150] ss:$8 sps:$4 sm:$0xff]   ;;  %vm1061_vm0 = vcmask 1041408  }
  0x50   :  { %v2083_v17 = vld [vmem:[#allocation5 + $0x164] ss:$8 sps:$4 sm:$0xff]   ;;  %v72_v19 = vld [vmem:[#allocation2] sm:$0xff]  ;;  %v2085_v21 = vld [vmem:[#allocation5 + $0x160] ss:$8 sps:$4 sm:$0xff]   ;;  %vm2440_vm1 = vmmov 0  }
  0x51   :  { %938 = vmatpush1.bf16.msra.mxu0 %v2070_v3  ;;  %v79_v14 = vunpack.c.0.s8 %v78_v10  ;;  %v76_v20 = vcombine.high %v72_v19, %v72_v19  ;;  %v2086_v22 = vld [vmem:[#allocation5 + $0x174] ss:$8 sps:$4 sm:$0xff]   ;;  %v2088_v25 = vld [vmem:[#allocation5 + $0x170] ss:$8 sps:$4 sm:$0xff]   ;;  %v2089_v26 = vld [vmem:[#allocation5 + $0x184] ss:$8 sps:$4 sm:$0xff]  }
  0x52   :  { %939 = vmatprep.subr.bf16.mxu0 %v2071_v4  ;;  %v2091_v28 = vld [vmem:[#allocation5 + $0x180] ss:$8 sps:$4 sm:$0xff]   ;;  %v2092_v29 = vld [vmem:[#allocation5 + $0x194] ss:$8 sps:$4 sm:$0xff]   ;;  %v2094_v30 = vld [vmem:[#allocation5 + $0x190] ss:$8 sps:$4 sm:$0xff]  }
  0x53   :  { %v2518_v18 = vsub.s32 %v79_v14, %v2515_v15  ;;  %v2095_v31 = vld [vmem:[#allocation5 + $0x1a4] ss:$8 sps:$4 sm:$0xff]   ;;  %v2097_v32 = vld [vmem:[#allocation5 + $0x1a0] ss:$8 sps:$4 sm:$0xff]   ;;  %v2098_v33 = vld [vmem:[#allocation5 + $0x1b4] ss:$8 sps:$4 sm:$0xff]  }
  0x54   :  { %v2100_v34 = vld [vmem:[#allocation5 + $0x1b0] ss:$8 sps:$4 sm:$0xff]   ;;  %v2162_v35 = vld [vmem:[#allocation5 + $0x4] ss:$8 sps:$4 sm:$0xff]   ;;  %v2164_v37 = vld [vmem:[#allocation5] ss:$8 sps:$4 sm:$0xff]  }
  0x55   :  { %940 = vmatpush1.bf16.msra.mxu0 %v2073_v5  ;;  %v2521_v23 = vrot.slane %v76_v20, %v2518_v18  ;;  %v2101_v36 = vld [vmem:[#allocation5 + $0x1c4] ss:$8 sps:$4 sm:$0xff]   ;;  %v2103_v38 = vld [vmem:[#allocation5 + $0x1c0] ss:$8 sps:$4 sm:$0xff]   ;;  %894 = vmatprep.subr.bf16.mxu1 %v2162_v35  ;;  %v2168_v39 = vld [vmem:[#allocation5 + $0x14] ss:$8 sps:$4 sm:$0xff]   ;;  %v2532_v53 = vrot.slane %v72_v19, %v2518_v18 }
  0x56   :  { %941 = vmatprep.subr.bf16.mxu0 %v2074_v6  ;;  %895 = vmatpush1.bf16.msra.mxu1 %v2164_v37  ;;  %v2170_v40 = vld [vmem:[#allocation5 + $0x10] ss:$8 sps:$4 sm:$0xff]   ;;  %v2104_v41 = vld [vmem:[#allocation5 + $0x1d4] ss:$8 sps:$4 sm:$0xff]   ;;  %v2174_v43 = vld [vmem:[#allocation5 + $0x24] ss:$8 sps:$4 sm:$0xff]  }
  0x57   :  { %v92_v24 = vcombine.high %v2521_v23, %v2521_v23  ;;  %896 = vmatprep.subr.bf16.mxu1 %v2168_v39  ;;  %v2106_v42 = vld [vmem:[#allocation5 + $0x1d0] ss:$8 sps:$4 sm:$0xff]   ;;  %v2176_v44 = vld [vmem:[#allocation5 + $0x20] ss:$8 sps:$4 sm:$0xff]   ;;  %v2107_v45 = vld [vmem:[#allocation5 + $0x1e4] ss:$8 sps:$4 sm:$0xff]   ;;  %v91_v56 = vcombine.high %v2532_v53, %v2532_v53  ;;  %v120_v61 = vpack.c.bf16 %v2521_v23, %v2521_v23 }
  0x58   :  { %v2525_v46 = vld [vmem:[#allocation2 + $0x8] sm:$0xff]  ;;  %v2109_v48 = vld [vmem:[#allocation5 + $0x1e0] ss:$8 sps:$4 sm:$0xff]   ;;  %v2186_v51 = vld [vmem:[#allocation5 + $0x44] ss:$8 sps:$4 sm:$0xff]   ;;  %s2441_s3 = smov [#allocation10]  }
  0x59   :  { %942 = vmatpush1.bf16.msra.mxu0 %v2076_v7  ;;  %v121_v27 = vpack.c.bf16 %v92_v24, %v92_v24  ;;  %v2180_v47 = vld [vmem:[#allocation5 + $0x34] ss:$8 sps:$4 sm:$0xff]   ;;  %v2182_v49 = vld [vmem:[#allocation5 + $0x30] ss:$8 sps:$4 sm:$0xff]   ;;  %v2529_v50 = vrot.slane %v2525_v46, %v2518_v18  ;;  %v2188_v55 = vld [vmem:[#allocation5 + $0x40] ss:$8 sps:$4 sm:$0xff]   ;;  %v119_v60 = vpack.c.bf16 %v91_v56, %v91_v56 }
  0x5a   :  { %943 = vmatprep.subr.bf16.mxu0 %v2077_v8  ;;  %897 = vmatpush1.bf16.msra.mxu1 %v2170_v40  ;;  %v2110_v52 = vld [vmem:[#allocation5 + $0x1f4] ss:$8 sps:$4 sm:$0xff]   ;;  %v2112_v54 = vld [vmem:[#allocation5 + $0x1f0] ss:$8 sps:$4 sm:$0xff]   ;;  %v2116_v59 = vld [vmem:[#allocation5 + $0x204] ss:$8 sps:$4 sm:$0xff]  }
  0x5b   :  { %967 = vmatprep.mubr.bf16.mxu0 %v121_v27  ;;  %898 = vmatprep.subr.bf16.mxu1 %v2174_v43  ;;  %v108_v57 = vcombine.high %v2529_v50, %v2529_v50  ;;  %v2192_v58 = vld [vmem:[#allocation5 + $0x54] ss:$8 sps:$4 sm:$0xff]   ;;  %v2194_v62 = vld [vmem:[#allocation5 + $0x50] ss:$8 sps:$4 sm:$0xff]   ;;  %v2114_v63 = vld [vmem:[#allocation5 + $0x200] ss:$8 sps:$4 sm:$0xff]  }
  0x5c   :  { %926 = vmatprep.mubr.bf16.mxu1 %v119_v60  ;;  %v2119_v1 = vld [vmem:[#allocation5 + $0x214] ss:$8 sps:$4 sm:$0xff]   ;;  %v2198_v2 = vld [vmem:[#allocation5 + $0x64] ss:$8 sps:$4 sm:$0xff]   ;;  %v2117_v3 = vld [vmem:[#allocation5 + $0x210] ss:$8 sps:$4 sm:$0xff]   ;;  %v122_v60 = vpack.c.bf16 %v2529_v50, %v2529_v50 }
  0x5d   :  { %944 = vmatpush1.bf16.msra.mxu0 %v2079_v12  ;;  %v123_v0 = vpack.c.bf16 %v108_v57, %v108_v57  ;;  %v2200_v4 = vld [vmem:[#allocation5 + $0x60] ss:$8 sps:$4 sm:$0xff]   ;;  %v2204_v5 = vld [vmem:[#allocation5 + $0x74] ss:$8 sps:$4 sm:$0xff]   ;;  %v2122_v6 = vld [vmem:[#allocation5 + $0x224] ss:$8 sps:$4 sm:$0xff]  }
  0x5e   :  { %945 = vmatprep.subr.bf16.mxu0 %v2080_v13  ;;  %899 = vmatpush1.bf16.msra.mxu1 %v2176_v44  ;;  %v2120_v7 = vld [vmem:[#allocation5 + $0x220] ss:$8 sps:$4 sm:$0xff]   ;;  %v2206_v8 = vld [vmem:[#allocation5 + $0x70] ss:$8 sps:$4 sm:$0xff]   ;;  %v2210_v9 = vld [vmem:[#allocation5 + $0x84] ss:$8 sps:$4 sm:$0xff]  }
  0x5f   :  { %900 = vmatprep.subr.bf16.mxu1 %v2180_v47  ;;  %v2125_v10 = vld [vmem:[#allocation5 + $0x234] ss:$8 sps:$4 sm:$0xff]   ;;  %v2123_v11 = vld [vmem:[#allocation5 + $0x230] ss:$8 sps:$4 sm:$0xff]   ;;  %v2212_v12 = vld [vmem:[#allocation5 + $0x80] ss:$8 sps:$4 sm:$0xff]  }
  0x60   :  { %v2216_v13 = vld [vmem:[#allocation5 + $0x94] ss:$8 sps:$4 sm:$0xff]   ;;  %v2128_v14 = vld [vmem:[#allocation5 + $0x244] ss:$8 sps:$4 sm:$0xff]   ;;  %v2248_v37 = vld [vmem:[#allocation5 + $0xe0] ss:$8 sps:$4 sm:$0xff]  }
  0x61   :  { %946 = vmatpush1.bf16.msra.mxu0 %v2082_v16  ;;  %v2126_v16 = vld [vmem:[#allocation5 + $0x240] ss:$8 sps:$4 sm:$0xff]   ;;  %v2222_v19 = vld [vmem:[#allocation5 + $0xa4] ss:$8 sps:$4 sm:$0xff]   ;;  %v2131_v20 = vld [vmem:[#allocation5 + $0x254] ss:$8 sps:$4 sm:$0xff]  }
  0x62   :  { %947 = vmatprep.subr.bf16.mxu0 %v2083_v17  ;;  %901 = vmatpush1.bf16.msra.mxu1 %v2182_v49  ;;  %v2218_v17 = vld [vmem:[#allocation5 + $0x90] ss:$8 sps:$4 sm:$0xff]   ;;  %v2228_v23 = vld [vmem:[#allocation5 + $0xb4] ss:$8 sps:$4 sm:$0xff]   ;;  %v2134_v24 = vld [vmem:[#allocation5 + $0x264] ss:$8 sps:$4 sm:$0xff]  }
  0x63   :  { %902 = vmatprep.subr.bf16.mxu1 %v2186_v51  ;;  %v2234_v27 = vld [vmem:[#allocation5 + $0xc4] ss:$8 sps:$4 sm:$0xff]   ;;  %v2252_v39 = vld [vmem:[#allocation5 + $0xf4] ss:$8 sps:$4 sm:$0xff]   ;;  %v2147_v44 = vld [vmem:[#allocation5 + $0x2b0] ss:$8 sps:$4 sm:$0xff]  }
  0x64   :  { %v2246_v35 = vld [vmem:[#allocation5 + $0xe4] ss:$8 sps:$4 sm:$0xff]   ;;  %v2149_v43 = vld [vmem:[#allocation5 + $0x2b4] ss:$8 sps:$4 sm:$0xff]   ;;  %v2153_v51 = vld [vmem:[#allocation5 + $0x2d0] ss:$8 sps:$4 sm:$0xff]  }
  0x65   :  { %948 = vmatpush1.bf16.msra.mxu0 %v2085_v21  ;;  %v2129_v21 = vld [vmem:[#allocation5 + $0x250] ss:$8 sps:$4 sm:$0xff]   ;;  %v2146_v40 = vld [vmem:[#allocation5 + $0x2a4] ss:$8 sps:$4 sm:$0xff]   ;;  %v2155_v49 = vld [vmem:[#allocation5 + $0x2d4] ss:$8 sps:$4 sm:$0xff]  }
  0x66   :  { %949 = vmatprep.subr.bf16.mxu0 %v2086_v22  ;;  %903 = vmatpush1.bf16.msra.mxu1 %v2188_v55  ;;  %v2224_v22 = vld [vmem:[#allocation5 + $0xa0] ss:$8 sps:$4 sm:$0xff]   ;;  %v2152_v47 = vld [vmem:[#allocation5 + $0x2c4] ss:$8 sps:$4 sm:$0xff]   ;;  %v2161_v56 = vld [vmem:[#allocation5 + $0x2f4] ss:$8 sps:$4 sm:$0xff]  }
  0x67   :  { %904 = vmatprep.subr.bf16.mxu1 %v2192_v58  ;;  %v2156_v55 = vld [vmem:[#allocation5 + $0x2e0] ss:$8 sps:$4 sm:$0xff]   ;;  %v2159_v57 = vld [vmem:[#allocation5 + $0x2f0] ss:$8 sps:$4 sm:$0xff]   ;;  %s1752_s1 = sshll.u32 %s2441_s3, 4  ;;  %s1753_s1 = int_to_ptr.vmem [resolvable:$true] %s1752_s1 }
  0x68   :  { %v2189_v50 = vld [vmem:[#allocation5 + $0x340] ss:$8 sps:$4 sm:$0xff]   ;;  %s2397_s14 = scalar_lea.vmem %s1753_s1, 32  ;;  %p2402_p5 = scmp.lt.s32.totalorder %s1753_s1, %s1753_s1 }
  0x69   :  { %950 = vmatpush1.bf16.msra.mxu0 %v2088_v25  ;;  %v2132_v25 = vld [vmem:[#allocation5 + $0x260] ss:$8 sps:$4 sm:$0xff]   ;;  %p2398_p4 = scmp.ne.s32.totalorder %s1753_s1, %s2397_s14  ;;  %p2403_p6 = scmp.lt.s32.totalorder %s2397_s14, %s2397_s14 }
  0x6a   :  { %951 = vmatprep.subr.bf16.mxu0 %v2089_v26  ;;  %905 = vmatpush1.bf16.msra.mxu1 %v2194_v62  ;;  %v2230_v26 = vld [vmem:[#allocation5 + $0xb0] ss:$8 sps:$4 sm:$0xff]   ;;  %v2173_v62 = vld [vmem:[#allocation5 + $0x314] ss:$8 sps:$4 sm:$0xff]  }
  0x6b   :  { %906 = vmatprep.subr.bf16.mxu1 %v2198_v2  ;;  %v2183_v2 = vld [vmem:[#allocation5 + $0x330] ss:$8 sps:$4 sm:$0xff]   ;;  %p2404_p7 = por %p2403_p6, %p2402_p5 }
  0x6d   :  { %952 = vmatpush1.bf16.msra.mxu0 %v2091_v28  ;;  %v2137_v28 = vld [vmem:[#allocation5 + $0x274] ss:$8 sps:$4 sm:$0xff]   ;;  %p2405_p8 = pnand %p2404_p7, %p2398_p4 }
  0x6e   :  { %953 = vmatprep.subr.bf16.mxu0 %v2092_v29  ;;  %907 = vmatpush1.bf16.msra.mxu1 %v2200_v4  ;;  %v2236_v29 = vld [vmem:[#allocation5 + $0xc0] ss:$8 sps:$4 sm:$0xff]   ;;  %v2197_v4 = vld [vmem:[#allocation5 + $0x354] ss:$8 sps:$4 sm:$0xff]  }
  0x6f   :  { %908 = vmatprep.subr.bf16.mxu1 %v2204_v5  ;;  %v2195_v5 = vld [vmem:[#allocation5 + $0x350] ss:$8 sps:$4 sm:$0xff]  }
  0x71   :  { %954 = vmatpush1.bf16.msra.mxu0 %v2094_v30  ;;  %v2135_v30 = vld [vmem:[#allocation5 + $0x270] ss:$8 sps:$4 sm:$0xff]  }
  0x72   :  { %955 = vmatprep.subr.bf16.mxu0 %v2095_v31  ;;  %909 = vmatpush1.bf16.msra.mxu1 %v2206_v8  ;;  %v2240_v31 = vld [vmem:[#allocation5 + $0xd4] ss:$8 sps:$4 sm:$0xff]  }
  0x73   :  { %910 = vmatprep.subr.bf16.mxu1 %v2210_v9  ;;  %v2209_v8 = vld [vmem:[#allocation5 + $0x374] ss:$8 sps:$4 sm:$0xff]   ;;  %v2207_v9 = vld [vmem:[#allocation5 + $0x370] ss:$8 sps:$4 sm:$0xff]  }
  0x75   :  { %956 = vmatpush1.bf16.msra.mxu0 %v2097_v32  ;;  %v2140_v32 = vld [vmem:[#allocation5 + $0x284] ss:$8 sps:$4 sm:$0xff]  }
  0x76   :  { %957 = vmatprep.subr.bf16.mxu0 %v2098_v33  ;;  %911 = vmatpush1.bf16.msra.mxu1 %v2212_v12  ;;  %v2242_v33 = vld [vmem:[#allocation5 + $0xd0] ss:$8 sps:$4 sm:$0xff]   ;;  %v2221_v12 = vld [vmem:[#allocation5 + $0x394] ss:$8 sps:$4 sm:$0xff]  }
  0x77   :  { %912 = vmatprep.subr.bf16.mxu1 %v2216_v13  ;;  %v2219_v13 = vld [vmem:[#allocation5 + $0x390] ss:$8 sps:$4 sm:$0xff]  }
  0x79   :  { %958 = vmatpush1.bf16.msra.mxu0 %v2100_v34  ;;  %v2138_v34 = vld [vmem:[#allocation5 + $0x280] ss:$8 sps:$4 sm:$0xff]  }
  0x7a   :  { %959 = vmatprep.subr.bf16.mxu0 %v2101_v36  ;;  %913 = vmatpush1.bf16.msra.mxu1 %v2218_v17  ;;  %v2143_v36 = vld [vmem:[#allocation5 + $0x294] ss:$8 sps:$4 sm:$0xff]  }
  0x7b   :  { %914 = vmatprep.subr.bf16.mxu1 %v2222_v19  ;;  %v2233_v17 = vld [vmem:[#allocation5 + $0x3b4] ss:$8 sps:$4 sm:$0xff]   ;;  %v2231_v19 = vld [vmem:[#allocation5 + $0x3b0] ss:$8 sps:$4 sm:$0xff]  }
  0x7d   :  { %960 = vmatpush1.bf16.msra.mxu0 %v2103_v38  ;;  %v2141_v38 = vld [vmem:[#allocation5 + $0x290] ss:$8 sps:$4 sm:$0xff]  }
  0x7e   :  { %961 = vmatprep.subr.bf16.mxu0 %v2104_v41  ;;  %915 = vmatpush1.bf16.msra.mxu1 %v2224_v22  ;;  %v2254_v41 = vld [vmem:[#allocation5 + $0xf0] ss:$8 sps:$4 sm:$0xff]   ;;  %v2245_v22 = vld [vmem:[#allocation5 + $0x3d4] ss:$8 sps:$4 sm:$0xff]  }
  0x7f   :  { %916 = vmatprep.subr.bf16.mxu1 %v2228_v23  ;;  %v2243_v23 = vld [vmem:[#allocation5 + $0x3d0] ss:$8 sps:$4 sm:$0xff]  }
  0x81   :  { %962 = vmatpush1.bf16.msra.mxu0 %v2106_v42  ;;  %v2144_v42 = vld [vmem:[#allocation5 + $0x2a0] ss:$8 sps:$4 sm:$0xff]  }
  0x82   :  { %963 = vmatprep.subr.bf16.mxu0 %v2107_v45  ;;  %917 = vmatpush1.bf16.msra.mxu1 %v2230_v26  ;;  %v118_v45 = vpack.c.bf16 %v2532_v53, %v2532_v53  ;;  %v2257_v26 = vld [vmem:[#allocation5 + $0x3f4] ss:$8 sps:$4 sm:$0xff]  }
  0x83   :  { %918 = vmatprep.subr.bf16.mxu1 %v2234_v27  ;;  %v2255_v27 = vld [vmem:[#allocation5 + $0x3f0] ss:$8 sps:$4 sm:$0xff]  }
  0x85   :  { %964 = vmatpush1.bf16.msra.mxu0 %v2109_v48  ;;  %v2150_v48 = vld [vmem:[#allocation5 + $0x2c0] ss:$8 sps:$4 sm:$0xff]  }
  0x86   :  { %965 = vmatprep.subr.bf16.mxu0 %v2110_v52  ;;  %919 = vmatpush1.bf16.msra.mxu1 %v2236_v29  ;;  %v93_v52 = vcombine.high %v2525_v46, %v2525_v46  ;;  %v2165_v46 = vld [vmem:[#allocation5 + $0x300] ss:$8 sps:$4 sm:$0xff]  }
  0x87   :  { %920 = vmatprep.subr.bf16.mxu1 %v2240_v31  ;;  %v2259_v29 = vld [vmem:[#allocation7 + $0x40] sm:$0xff]   ;;  %v2261_v31 = vld [vmem:[#allocation7 + $0x48] sm:$0xff]  }
  0x88   :  { %v2545_v53 = vrot.slane %v93_v52, %v2518_v18  ;;  %v2171_v18 = vld [vmem:[#allocation5 + $0x310] ss:$8 sps:$4 sm:$0xff]  }
  0x89   :  { %966 = vmatpush1.bf16.msra.mxu0 %v2112_v54  ;;  %v2158_v54 = vld [vmem:[#allocation5 + $0x2e4] ss:$8 sps:$4 sm:$0xff]  }
  0x8a   :  { %976 = vmatprep.subr.bf16.mxu0 %v2116_v59  ;;  %921 = vmatpush1.bf16.msra.mxu1 %v2242_v33  ;;  %v109_v58 = vcombine.high %v2545_v53, %v2545_v53  ;;  %v2167_v59 = vld [vmem:[#allocation5 + $0x304] ss:$8 sps:$4 sm:$0xff]   ;;  %v2263_v33 = vld [vmem:[#allocation7 + $0x50] sm:$0xff]  }
  0x8b   :  { %922 = vmatprep.subr.bf16.mxu1 %v2246_v35 }
  0x8c   :  { %968 = vmatmul.mubr.bf16.vlgmr.msra.gmra.mrb[0].mxu0 %v120_v61  ;;  %v125_v61 = vpack.c.bf16 %v109_v58, %v109_v58 }
  0x8d   :  { %977 = vmatpush1.bf16.msra.mxu0 %v2114_v63  ;;  %1008 = vmatprep.mubr.bf16.mxu0 %v123_v0  ;;  %v2179_v63 = vld [vmem:[#allocation5 + $0x324] ss:$8 sps:$4 sm:$0xff]   ;;  %v2177_v0 = vld [vmem:[#allocation5 + $0x320] ss:$8 sps:$4 sm:$0xff]  }
  0x8e   :  { %978 = vmatprep.subr.bf16.mxu0 %v2119_v1  ;;  %923 = vmatpush1.bf16.msra.mxu1 %v2248_v37  ;;  %v2185_v1 = vld [vmem:[#allocation5 + $0x334] ss:$8 sps:$4 sm:$0xff]  }
  0x8f   :  { %924 = vmatprep.subr.bf16.mxu1 %v2252_v39 }
  0x91   :  { %979 = vmatpush1.bf16.msra.mxu0 %v2117_v3  ;;  %v2191_v3 = vld [vmem:[#allocation5 + $0x344] ss:$8 sps:$4 sm:$0xff]  }
  0x92   :  { %980 = vmatprep.subr.bf16.mxu0 %v2122_v6  ;;  %925 = vmatpush1.bf16.msra.mxu1 %v2254_v41  ;;  %v2203_v6 = vld [vmem:[#allocation5 + $0x364] ss:$8 sps:$4 sm:$0xff]  }
  0x93   :  { %1931 = vmatprep.subr.bf16.mxu1 %v2259_v29  ;;  %v2267_v41 = vld [vmem:[#allocation7 + $0x60] sm:$0xff]  }
  0x95   :  { %981 = vmatpush1.bf16.msra.mxu0 %v2120_v7  ;;  %927 = vmatmul.mubr.bf16.vlgmr.msra.gmra.mrb[0].mxu1 %v118_v45  ;;  %v2201_v7 = vld [vmem:[#allocation5 + $0x360] ss:$8 sps:$4 sm:$0xff]   ;;  %v2271_v45 = vld [vmem:[#allocation7 + $0x70] sm:$0xff]  }
  0x96   :  { %982 = vmatprep.subr.bf16.mxu0 %v2125_v10  ;;  %v2215_v10 = vld [vmem:[#allocation5 + $0x384] ss:$8 sps:$4 sm:$0xff]  }
  0x99   :  { %983 = vmatpush1.bf16.msra.mxu0 %v2123_v11  ;;  %v2213_v11 = vld [vmem:[#allocation5 + $0x380] ss:$8 sps:$4 sm:$0xff]  }
  0x9a   :  { %984 = vmatprep.subr.bf16.mxu0 %v2128_v14  ;;  %v2227_v14 = vld [vmem:[#allocation5 + $0x3a4] ss:$8 sps:$4 sm:$0xff]  }
  0x9d   :  { %985 = vmatpush1.bf16.msra.mxu0 %v2126_v16  ;;  %v2225_v16 = vld [vmem:[#allocation5 + $0x3a0] ss:$8 sps:$4 sm:$0xff]  }
  0x9e   :  { %986 = vmatprep.subr.bf16.mxu0 %v2131_v20  ;;  %v2239_v20 = vld [vmem:[#allocation5 + $0x3c4] ss:$8 sps:$4 sm:$0xff]  }
  0xa1   :  { %987 = vmatpush1.bf16.msra.mxu0 %v2129_v21  ;;  %v2237_v21 = vld [vmem:[#allocation5 + $0x3c0] ss:$8 sps:$4 sm:$0xff]  }
  0xa2   :  { %988 = vmatprep.subr.bf16.mxu0 %v2134_v24  ;;  %v2251_v24 = vld [vmem:[#allocation5 + $0x3e4] ss:$8 sps:$4 sm:$0xff]  }
  0xa5   :  { %989 = vmatpush1.bf16.msra.mxu0 %v2132_v25  ;;  %v2249_v25 = vld [vmem:[#allocation5 + $0x3e0] ss:$8 sps:$4 sm:$0xff]  }
  0xa6   :  { %990 = vmatprep.subr.bf16.mxu0 %v2137_v28  ;;  %v124_v28 = vpack.c.bf16 %v2545_v53, %v2545_v53 }
  0xa9   :  { %991 = vmatpush1.bf16.msra.mxu0 %v2135_v30  ;;  %v2260_v30 = vld [vmem:[#allocation7] sm:$0xff]  }
  0xaa   :  { %992 = vmatprep.subr.bf16.mxu0 %v2140_v32  ;;  %1932 = vmatpush3.bf16.msra.mxu1 %v2260_v30  ;;  %v2262_v32 = vld [vmem:[#allocation7 + $0x8] sm:$0xff]  }
  0xab   :  { %1933 = vmatprep.subr.bf16.mxu1 %v2261_v31 }
  0xad   :  { %993 = vmatpush1.bf16.msra.mxu0 %v2138_v34  ;;  %v2264_v34 = vld [vmem:[#allocation7 + $0x10] sm:$0xff]  }
  0xae   :  { %994 = vmatprep.subr.bf16.mxu0 %v2143_v36  ;;  %1934 = vmatpush3.bf16.msra.mxu1 %v2262_v32  ;;  %v2265_v36 = vld [vmem:[#allocation7 + $0x58] sm:$0xff]   ;;  %v2438_v32 = vmov 1966171168  }
  0xaf   :  { %1935 = vmatprep.subr.bf16.mxu1 %v2263_v33  ;;  %v1108_v33 = vunpack.c.l.s4 %v2438_v32 }
  0xb1   :  { %995 = vmatpush1.bf16.msra.mxu0 %v2141_v38  ;;  %v2266_v38 = vld [vmem:[#allocation7 + $0x18] sm:$0xff]  }
  0xb2   :  { %996 = vmatprep.subr.bf16.mxu0 %v2146_v40  ;;  %1936 = vmatpush3.bf16.msra.mxu1 %v2264_v34  ;;  %v1109_v34 = vunpack.c.0.s8 %v1108_v33 }
  0xb3   :  { %1937 = vmatprep.subr.bf16.mxu1 %v2265_v36 }
  0xb4   :  { %v1112_v36 = vsub.s32 %v1109_v34, %v2515_v15  ;;  %v1342_v34 = vld [vmem:[#allocation8 + $0x1] ss:$0 sm:$0xff] }
  0xb5   :  { %997 = vmatpush1.bf16.msra.mxu0 %v2144_v42  ;;  %v2268_v42 = vld [vmem:[#allocation7 + $0x20] sm:$0xff]  }
  0xb6   :  { %998 = vmatprep.subr.bf16.mxu0 %v2149_v43  ;;  %1938 = vmatpush3.bf16.msra.mxu1 %v2266_v38  ;;  %v2269_v43 = vld [vmem:[#allocation7 + $0x68] sm:$0xff]  }
  0xb7   :  { %1939 = vmatprep.subr.bf16.mxu1 %v2267_v41 }
  0xb9   :  { %999 = vmatpush1.bf16.msra.mxu0 %v2147_v44  ;;  %v2270_v44 = vld [vmem:[#allocation7 + $0x28] sm:$0xff]  }
  0xba   :  { %1000 = vmatprep.subr.bf16.mxu0 %v2152_v47  ;;  %1940 = vmatpush3.bf16.msra.mxu1 %v2268_v42  ;;  %v2272_v47 = vld [vmem:[#allocation7 + $0x30] sm:$0xff]   ;;  %v1126_v42 = vsub.s32 0, %v2515_v15 }
  0xbb   :  { %1941 = vmatprep.subr.bf16.mxu1 %v2269_v43  ;;  %v1130_v43 = vsub.s32 1, %v2515_v15 }
  0xbd   :  { %1001 = vmatpush1.bf16.msra.mxu0 %v2150_v48  ;;  %v2273_v48 = vld [vmem:[#allocation7 + $0x78] sm:$0xff]  }
  0xbe   :  { %1002 = vmatprep.subr.bf16.mxu0 %v2155_v49  ;;  %1942 = vmatpush3.bf16.msra.mxu1 %v2270_v44  ;;  %v2274_v49 = vld [vmem:[#allocation7 + $0x38] sm:$0xff]  }
  0xbf   :  { %1943 = vmatprep.subr.bf16.mxu1 %v2271_v45 }
  0xc1   :  { %1003 = vmatpush1.bf16.msra.mxu0 %v2153_v51 }
  0xc2   :  { %1004 = vmatprep.subr.bf16.mxu0 %v2158_v54  ;;  %1944 = vmatpush3.bf16.msra.mxu1 %v2272_v47 }
  0xc3   :  { %1945 = vmatprep.subr.bf16.mxu1 %v2273_v48 }
  0xc5   :  { %1005 = vmatpush1.bf16.msra.mxu0 %v2156_v55 }
  0xc6   :  { %1006 = vmatprep.subr.bf16.mxu0 %v2161_v56  ;;  %1946 = vmatpush3.bf16.msra.mxu1 %v2274_v49 }
  0xc9   :  { %1007 = vmatpush1.bf16.msra.mxu0 %v2159_v57 }
  0xca   :  { %1017 = vmatprep.subr.bf16.mxu0 %v2167_v59 }
  0xcc   :  { %1009 = vmatmul.mubr.bf16.vlgmr.msra.gmra.mrb[0].mxu0 %v122_v60 }
  0xcd   :  { %1018 = vmatpush1.bf16.msra.mxu0 %v2165_v46  ;;  %1049 = vmatprep.mubr.bf16.mxu0 %v125_v61 }
  0xce   :  { %1019 = vmatprep.subr.bf16.mxu0 %v2173_v62 }
  0xd1   :  { %1020 = vmatpush1.bf16.msra.mxu0 %v2171_v18 }
  0xd2   :  { %1021 = vmatprep.subr.bf16.mxu0 %v2179_v63 }
  0xd5   :  { %1022 = vmatpush1.bf16.msra.mxu0 %v2177_v0 }
  0xd6   :  { %1023 = vmatprep.subr.bf16.mxu0 %v2185_v1 }
  0xd9   :  { %1024 = vmatpush1.bf16.msra.mxu0 %v2183_v2 }
  0xda   :  { %1025 = vmatprep.subr.bf16.mxu0 %v2191_v3 }
  0xdd   :  { %1026 = vmatpush1.bf16.msra.mxu0 %v2189_v50 }
  0xde   :  { %1027 = vmatprep.subr.bf16.mxu0 %v2197_v4 }
  0xe1   :  { %1028 = vmatpush1.bf16.msra.mxu0 %v2195_v5 }
  0xe2   :  { %1029 = vmatprep.subr.bf16.mxu0 %v2203_v6 }
  0xe5   :  { %1030 = vmatpush1.bf16.msra.mxu0 %v2201_v7 }
  0xe6   :  { %1031 = vmatprep.subr.bf16.mxu0 %v2209_v8 }
  0xe9   :  { %1032 = vmatpush1.bf16.msra.mxu0 %v2207_v9 }
  0xea   :  { %1033 = vmatprep.subr.bf16.mxu0 %v2215_v10 }
  0xed   :  { %1034 = vmatpush1.bf16.msra.mxu0 %v2213_v11 }
  0xee   :  { %1035 = vmatprep.subr.bf16.mxu0 %v2221_v12 }
  0xf1   :  { %1036 = vmatpush1.bf16.msra.mxu0 %v2219_v13 }
  0xf2   :  { %1037 = vmatprep.subr.bf16.mxu0 %v2227_v14 }
  0xf5   :  { %1038 = vmatpush1.bf16.msra.mxu0 %v2225_v16 }
  0xf6   :  { %1039 = vmatprep.subr.bf16.mxu0 %v2233_v17 }
  0xf9   :  { %1040 = vmatpush1.bf16.msra.mxu0 %v2231_v19 }
  0xfa   :  { %1041 = vmatprep.subr.bf16.mxu0 %v2239_v20 }
  0xfd   :  { %1042 = vmatpush1.bf16.msra.mxu0 %v2237_v21 }
  0xfe   :  { %1043 = vmatprep.subr.bf16.mxu0 %v2245_v22 }
 0x101   :  { %1044 = vmatpush1.bf16.msra.mxu0 %v2243_v23 }
 0x102   :  { %1045 = vmatprep.subr.bf16.mxu0 %v2251_v24 }
 0x105   :  { %1046 = vmatpush1.bf16.msra.mxu0 %v2249_v25 }
 0x106   :  { %1047 = vmatprep.subr.bf16.mxu0 %v2257_v26 }
 0x109   :  { %1048 = vmatpush1.bf16.msra.mxu0 %v2255_v27 }
 0x10c   :  { %1050 = vmatmul.mubr.bf16.vlgmr.msra.gmra.mrb[0].mxu0 %v124_v28 }
 0x168   :  { %v928_v35 = vpop.f32.mrb[0].mxu1 }
 0x169   :  { %v930_v37 = vpop.f32.mrb[1].mxu1 }
 0x16a   :  { %v932_v39 = vpop.f32.mrb[2].mxu1 }
 0x16b   :  { %v933_v40 = vpop.f32.mrb[3].mxu1 }
 0x16c   :  { %v1058_v40 = vld [vmem:[#allocation8] ss:$8 sm:$0x3] }
 0x1df   :  { %v1051_v51 = vpop.f32.mrb[0].mxu0 }
 0x1e0   :  { %v2553_v52 = vadd.f32 %v1051_v51, %v928_v35  ;;  %v1053_v54 = vpop.f32.mrb[1].mxu0 }
 0x1e1   :  { %v2041_v55 = vadd.f32 %v1053_v54, %v930_v37  ;;  %v1055_v53 = vpop.f32.mrb[2].mxu0 }
 0x1e2   :  { %v1062_v56 = vsel %vm1061_vm0, %v2553_v52, 0.0  ;;  %v1078_v57 = vmul.f32 %v2553_v52, %v2553_v52  ;;  %v1056_v58 = vpop.f32.mrb[3].mxu0 }
 0x1e3   :  { %v1063_v59 = vrot.slane %v1062_v56, 4  ;;  %v1069_v60 = vsel %vm1061_vm0, %v2041_v55, 0.0  ;;  %v1079_v46 = vmul.f32 %v2041_v55, %v2041_v55 }
 0x1e4   :  { %v1080_v61 = vsel %vm1061_vm0, %v1078_v57, 0.0  ;;  %v1070_v62 = vrot.slane %v1069_v60, 4  ;;  %v1060_v57 = vld [vmem:[#allocation8 + $0x4] ss:$8 sm:$0x3] }
 0x1e5   :  { %v1064_v18 = vadd.f32 %v1063_v59, %v1062_v56  ;;  %v1081_v63 = vrot.slane %v1080_v61, 4  ;;  %v1087_v0 = vsel %vm1061_vm0, %v1079_v46, 0.0 }
 0x1e6   :  { %v1071_v1 = vadd.f32 %v1070_v62, %v1069_v60  ;;  %v1088_v2 = vrot.slane %v1087_v0, 4 }
 0x1e7   :  { %v1065_v3 = vrot.slane %v1064_v18, 2  ;;  %v1082_v50 = vadd.f32 %v1081_v63, %v1080_v61 }
 0x1e8   :  { %v1072_v4 = vrot.slane %v1071_v1, 2  ;;  %v1089_v5 = vadd.f32 %v1088_v2, %v1087_v0  ;;  %v2277_v2 = vld [vmem:[#allocation7 + $0x90] sm:$0xff]  }
 0x1e9   :  { %v1066_v6 = vadd.f32 %v1065_v3, %v1064_v18  ;;  %v1083_v7 = vrot.slane %v1082_v50, 2  ;;  %v2278_v3 = vld [vmem:[#allocation7 + $0x98] sm:$0xff]  }
 0x1ea   :  { %v1073_v8 = vadd.f32 %v1072_v4, %v1071_v1  ;;  %v1090_v9 = vrot.slane %v1089_v5, 2  ;;  %v2439_v1 = vmov 0.0   ;;  %v2280_v4 = vld [vmem:[#allocation7 + $0xa8] sm:$0xff]  }
 0x1eb   :  { %v1067_v10 = vrot.slane %v1066_v6, 1  ;;  %v1084_v11 = vadd.f32 %v1083_v7, %v1082_v50  ;;  %1980 = vmatprep.subr.bf16.mxu1 %v2439_v1  ;;  %v2279_v50 = vld [vmem:[#allocation7 + $0xa0] sm:$0xff]  }
 0x1ec   :  { %v1074_v12 = vrot.slane %v1073_v8, 1  ;;  %v1091_v13 = vadd.f32 %v1090_v9, %v1089_v5  ;;  %v2281_v5 = vld [vmem:[#allocation7 + $0xb0] sm:$0xff]  }
 0x1ed   :  { %v1068_v14 = vadd.f32 %v1067_v10, %v1066_v6  ;;  %v1085_v16 = vrot.slane %v1084_v11, 1  ;;  %v2282_v6 = vld [vmem:[#allocation7 + $0xb8] sm:$0xff]  }
 0x1ee   :  { %v1075_v17 = vadd.f32 %v1074_v12, %v1073_v8  ;;  %v1092_v19 = vrot.slane %v1091_v13, 1 }
 0x1ef   :  { %v1076_v20 = vmul.f32 0.5, %v1068_v14  ;;  %v1086_v21 = vadd.f32 %v1085_v16, %v1084_v11 }
 0x1f0   :  { %v1077_v22 = vmul.f32 0.5, %v1075_v17  ;;  %v1093_v23 = vadd.f32 %v1092_v19, %v1091_v13 }
 0x1f1   :  { %v1094_v24 = vmul.f32 0.5, %v1086_v21  ;;  %v1096_v25 = vmul.f32 %v1076_v20, %v1076_v20 }
 0x1f2   :  { %v1095_v26 = vmul.f32 0.5, %v1093_v23  ;;  %v1097_v27 = vmul.f32 %v1077_v22, %v1077_v22 }
 0x1f3   :  { %v1098_v28 = vsub.f32 %v1094_v24, %v1096_v25 }
 0x1f4   :  { %v1099_v29 = vsub.f32 %v1095_v26, %v1097_v27 }
 0x1f5   :  { %v1100_v30 = vadd.f32 0.001, %v1098_v28 }
 0x1f6   :  { %v1101_v31 = vadd.f32 0.001, %v1099_v29 }
 0x1f7   :  { %2299 = vrsqrt.f32 %v1100_v30 }
 0x1f8   :  { %2301 = vrsqrt.f32 %v1101_v31 }
 0x201   :  { %v2300_v35 = vpop.eup %2299 }
 0x202   :  { %v2302_v37 = vpop.eup %2301 }
 0x203   :  { %v1106_v38 = vcombine.low %v2300_v35, %v2302_v37  ;;  %v1343_v37 = vld [vmem:[#allocation8 + $0x5] ss:$0 sm:$0xff] }
 0x205   :  { %v1113_v39 = vrot.slane %v1106_v38, %v1112_v36 }
 0x207   :  { %v1120_v41 = vrot.slane %v1113_v39, %v1112_v36 }
 0x209   :  { %v1122_v44 = vmul.f32 %v1120_v41, %v1058_v40 }
 0x20b   :  { %v1127_v45 = vrot.slane %v1122_v44, %v1126_v42  ;;  %v1131_v47 = vrot.slane %v1122_v44, %v1130_v43  ;;  %v2283_v44 = vld [vmem:[#allocation7 + $0xc0] sm:$0xff]  }
 0x20d   :  { %v1135_v48 = vmul.f32 %v2041_v55, %v1131_v47  ;;  %v1136_v49 = vmul.f32 %v1127_v45, %v1076_v20  ;;  %v1137_v51 = vmul.f32 %v1131_v47, %v1077_v22  ;;  %v1134_v54 = vmul.f32 %v2553_v52, %v1127_v45  ;;  %v2275_v55 = vld [vmem:[#allocation7 + $0x80] sm:$0xff]   ;;  %v2276_v52 = vld [vmem:[#allocation7 + $0x88] sm:$0xff]   ;;  %v2285_v47 = vld [vmem:[#allocation7 + $0xd0] sm:$0xff]  }
 0x20e   :  { %v2284_v45 = vld [vmem:[#allocation7 + $0xc8] sm:$0xff]  }
 0x20f   :  { %v1140_v53 = vcombine.low %v1136_v49, %v1137_v51  ;;  %v2287_v49 = vld [vmem:[#allocation7 + $0xe0] sm:$0xff]   ;;  %v2288_v51 = vld [vmem:[#allocation7 + $0xe8] sm:$0xff]  }
 0x211   :  { %v1147_v56 = vrot.slane %v1140_v53, %v1112_v36  ;;  %v2290_v53 = vld [vmem:[#allocation7 + $0xf8] sm:$0xff]  }
 0x213   :  { %v1154_v58 = vrot.slane %v1147_v56, %v1112_v36 }
 0x215   :  { %v1156_v59 = vsub.f32 %v1060_v57, %v1154_v58 }
 0x217   :  { %v1165_v60 = vrot.slane %v1156_v59, %v1130_v43  ;;  %v1161_v46 = vrot.slane %v1156_v59, %v1126_v42 }
 0x219   :  { %v1169_v61 = vadd.f32 %v1165_v60, %v1135_v48  ;;  %v1168_v62 = vadd.f32 %v1161_v46, %v1134_v54  ;;  %v2286_v48 = vld [vmem:[#allocation7 + $0xd8] sm:$0xff]   ;;  %v2289_v54 = vld [vmem:[#allocation7 + $0xf0] sm:$0xff]  }
 0x21b   :  { %v1171_v18 = vmax.f32 %v1169_v61, 0.0  ;;  %v1170_v63 = vmax.f32 %v1168_v62, 0.0 }
 0x21d   :  { %v1205_v15 = vpack.c.bf16 %v1171_v18, %v1171_v18  ;;  %v1204_v0 = vpack.c.bf16 %v1170_v63, %v1170_v63 }
 0x21f   :  { %1334 = vmatprep.mubr.bf16.mxu1 %v1205_v15 }
 0x220   :  { %1335 = vmatmul.mubr.bf16.vlgmr.msra.gmra.mrb[4].mxu1 %v1204_v0 }
 0x221   :  { %1981 = vmatpush3.bf16.msra.mxu1 %v2275_v55  ;;  %1996 = vmatprep.mubr.msk.bf16.mxu1 %vm2440_vm1, %v2439_v1 }
 0x222   :  { %1982 = vmatprep.subr.bf16.mxu1 %v2439_v1 }
 0x225   :  { %1983 = vmatpush3.bf16.msra.mxu1 %v2276_v52 }
 0x226   :  { %1984 = vmatprep.subr.bf16.mxu1 %v2439_v1 }
 0x229   :  { %1985 = vmatpush3.bf16.msra.mxu1 %v2277_v2 }
 0x22a   :  { %1986 = vmatprep.subr.bf16.mxu1 %v2439_v1 }
 0x22d   :  { %1987 = vmatpush3.bf16.msra.mxu1 %v2278_v3 }
 0x22e   :  { %1988 = vmatprep.subr.bf16.mxu1 %v2439_v1 }
 0x231   :  { %1989 = vmatpush3.bf16.msra.mxu1 %v2279_v50 }
 0x232   :  { %1990 = vmatprep.subr.bf16.mxu1 %v2439_v1 }
 0x235   :  { %1991 = vmatpush3.bf16.msra.mxu1 %v2280_v4 }
 0x236   :  { %1992 = vmatprep.subr.bf16.mxu1 %v2439_v1 }
 0x239   :  { %1993 = vmatpush3.bf16.msra.mxu1 %v2281_v5 }
 0x23a   :  { %1994 = vmatprep.subr.bf16.mxu1 %v2439_v1 }
 0x23d   :  { %1995 = vmatpush3.bf16.msra.mxu1 %v2282_v6 }
 0x23e   :  { %2000 = vmatprep.subr.bf16.mxu1 %v2439_v1 }
 0x2f3   :  { %v1947_v7 = vpop.f32.mrb[4].mxu1 }
 0x2f4   :  { %v1948_v8 = vpop.f32.mrb[5].mxu1 }
 0x2f5   :  { %v1949_v9 = vadd.f32 %v1948_v8, %v1947_v7  ;;  %v1950_v10 = vpop.f32.mrb[6].mxu1 }
 0x2f6   :  { %v1951_v11 = vpop.f32.mrb[7].mxu1 }
 0x2f7   :  { %v1344_v12 = vsel %vm1061_vm0, %v1949_v9, 0.0  ;;  %v1352_v13 = vmul.f32 %v1949_v9, %v1949_v9  ;;  %v1476_v11 = vld [vmem:[#allocation8 + $0x2] ss:$0 sm:$0xff] }
 0x2f8   :  { %v1345_v14 = vrot.slane %v1344_v12, 4 }
 0x2f9   :  { %v1353_v16 = vsel %vm1061_vm0, %v1352_v13, 0.0 }
 0x2fa   :  { %v1346_v17 = vadd.f32 %v1345_v14, %v1344_v12  ;;  %v1354_v19 = vrot.slane %v1353_v16, 4  ;;  %v1477_v14 = vld [vmem:[#allocation8 + $0x6] ss:$0 sm:$0xff] }
 0x2fc   :  { %v1347_v20 = vrot.slane %v1346_v17, 2  ;;  %v1355_v21 = vadd.f32 %v1354_v19, %v1353_v16 }
 0x2fe   :  { %v1348_v22 = vadd.f32 %v1347_v20, %v1346_v17  ;;  %v1356_v23 = vrot.slane %v1355_v21, 2 }
 0x300   :  { %v1349_v24 = vrot.slane %v1348_v22, 1  ;;  %v1357_v25 = vadd.f32 %v1356_v23, %v1355_v21  ;;  %v2291_v23 = vld [vmem:[#allocation7 + $0x100] sm:$0xff]  }
 0x302   :  { %v1350_v26 = vadd.f32 %v1349_v24, %v1348_v22  ;;  %v1358_v27 = vrot.slane %v1357_v25, 1  ;;  %v2292_v24 = vld [vmem:[#allocation7 + $0x108] sm:$0xff]  }
 0x304   :  { %v1351_v28 = vmul.f32 0.5, %v1350_v26  ;;  %v1359_v29 = vadd.f32 %v1358_v27, %v1357_v25  ;;  %v2293_v25 = vld [vmem:[#allocation7 + $0x110] sm:$0xff]   ;;  %v2294_v26 = vld [vmem:[#allocation7 + $0x118] sm:$0xff]   ;;  %v2295_v27 = vld [vmem:[#allocation7 + $0x120] sm:$0xff]  }
 0x306   :  { %v1360_v30 = vmul.f32 0.5, %v1359_v29  ;;  %v1361_v31 = vmul.f32 %v1351_v28, %v1351_v28  ;;  %v2297_v29 = vld [vmem:[#allocation7 + $0x130] sm:$0xff]  }
 0x308   :  { %v1362_v32 = vsub.f32 %v1360_v30, %v1361_v31  ;;  %v2298_v30 = vld [vmem:[#allocation7 + $0x138] sm:$0xff]  }
 0x30a   :  { %v1363_v33 = vadd.f32 0.001, %v1362_v32 }
 0x30c   :  { %2303 = vrsqrt.f32 %v1363_v33 }
 0x316   :  { %v2304_v35 = vpop.eup %2303 }
 0x317   :  { %v1365_v36 = vmul.f32 %v2304_v35, %v1342_v34 }
 0x319   :  { %v1367_v38 = vmul.f32 %v1365_v36, %v1351_v28  ;;  %v1366_v39 = vmul.f32 %v1949_v9, %v1365_v36  ;;  %v2296_v28 = vld [vmem:[#allocation7 + $0x128] sm:$0xff]  }
 0x31b   :  { %v1368_v40 = vsub.f32 %v1343_v37, %v1367_v38 }
 0x31d   :  { %v1369_v41 = vadd.f32 %v1368_v40, %v1366_v39 }
 0x31f   :  { %v1370_v42 = vmax.f32 %v1369_v41, 0.0 }
 0x321   :  { %v1387_v43 = vpack.c.bf16 %v1370_v42, %v1370_v42 }
 0x323   :  { %1997 = vmatmul.mubr.bf16.vlgmr.msra.gmra.mrb[8].mxu1 %v1387_v43 }
 0x324   :  { %2016 = vmatprep.mubr.msk.bf16.mxu1 %vm2440_vm1, %v2439_v1  ;;  %2001 = vmatpush3.bf16.msra.mxu1 %v2283_v44 }
 0x325   :  { %2002 = vmatprep.subr.bf16.mxu1 %v2439_v1 }
 0x328   :  { %2003 = vmatpush3.bf16.msra.mxu1 %v2284_v45 }
 0x329   :  { %2004 = vmatprep.subr.bf16.mxu1 %v2439_v1 }
 0x32c   :  { %2005 = vmatpush3.bf16.msra.mxu1 %v2285_v47 }
 0x32d   :  { %2006 = vmatprep.subr.bf16.mxu1 %v2439_v1 }
 0x330   :  { %2007 = vmatpush3.bf16.msra.mxu1 %v2286_v48 }
 0x331   :  { %2008 = vmatprep.subr.bf16.mxu1 %v2439_v1 }
 0x334   :  { %2009 = vmatpush3.bf16.msra.mxu1 %v2287_v49 }
 0x335   :  { %2010 = vmatprep.subr.bf16.mxu1 %v2439_v1 }
 0x338   :  { %2011 = vmatpush3.bf16.msra.mxu1 %v2288_v51 }
 0x339   :  { %2012 = vmatprep.subr.bf16.mxu1 %v2439_v1 }
 0x33c   :  { %2013 = vmatpush3.bf16.msra.mxu1 %v2289_v54 }
 0x33d   :  { %2014 = vmatprep.subr.bf16.mxu1 %v2439_v1 }
 0x340   :  { %2015 = vmatpush3.bf16.msra.mxu1 %v2290_v53 }
 0x341   :  { %2020 = vmatprep.subr.bf16.mxu1 %v2439_v1 }
 0x3f6   :  { %v1470_v56 = vpop.f32.mrb[8].mxu1 }
 0x3f7   :  { %v1478_v57 = vsel %vm1061_vm0, %v1470_v56, 0.0  ;;  %v1486_v58 = vmul.f32 %v1470_v56, %v1470_v56  ;;  %v1998_v59 = vpop.f32.mrb[9].mxu1 }
 0x3f8   :  { %v1479_v60 = vrot.slane %v1478_v57, 4  ;;  %v1473_v46 = vpop.f32.mrb[10].mxu1 }
 0x3f9   :  { %v1487_v61 = vsel %vm1061_vm0, %v1486_v58, 0.0  ;;  %v1999_v62 = vpop.f32.mrb[11].mxu1  ;;  %v1610_v58 = vld [vmem:[#allocation8 + $0x3] ss:$0 sm:$0xff]  ;;  %v1611_v46 = vld [vmem:[#allocation8 + $0x7] ss:$0 sm:$0xff] }
 0x3fa   :  { %v1480_v18 = vadd.f32 %v1479_v60, %v1478_v57  ;;  %v1488_v63 = vrot.slane %v1487_v61, 4 }
 0x3fc   :  { %v1481_v15 = vrot.slane %v1480_v18, 2  ;;  %v1489_v0 = vadd.f32 %v1488_v63, %v1487_v61 }
 0x3fe   :  { %v1482_v55 = vadd.f32 %v1481_v15, %v1480_v18  ;;  %v1490_v52 = vrot.slane %v1489_v0, 2 }
 0x400   :  { %v1483_v2 = vrot.slane %v1482_v55, 1  ;;  %v1491_v3 = vadd.f32 %v1490_v52, %v1489_v0 }
 0x402   :  { %v1484_v50 = vadd.f32 %v1483_v2, %v1482_v55  ;;  %v1492_v4 = vrot.slane %v1491_v3, 1  ;;  %v1656_v55 = vld [vmem:[#allocation8 + $0x10] ss:$0 sm:$0xff] }
 0x404   :  { %v1485_v5 = vmul.f32 0.5, %v1484_v50  ;;  %v1493_v6 = vadd.f32 %v1492_v4, %v1491_v3 }
 0x406   :  { %v1494_v7 = vmul.f32 0.5, %v1493_v6  ;;  %v1495_v8 = vmul.f32 %v1485_v5, %v1485_v5 }
 0x408   :  { %v1496_v9 = vsub.f32 %v1494_v7, %v1495_v8 }
 0x40a   :  { %v1497_v10 = vadd.f32 0.001, %v1496_v9 }
 0x40c   :  { %2305 = vrsqrt.f32 %v1497_v10 }
 0x416   :  { %v2306_v12 = vpop.eup %2305 }
 0x417   :  { %v1499_v13 = vmul.f32 %v2306_v12, %v1476_v11 }
 0x419   :  { %v1501_v16 = vmul.f32 %v1499_v13, %v1485_v5  ;;  %v1500_v17 = vmul.f32 %v1499_v13, %v1470_v56 }
 0x41b   :  { %v1502_v19 = vsub.f32 %v1477_v14, %v1501_v16 }
 0x41d   :  { %v1503_v20 = vadd.f32 %v1502_v19, %v1500_v17 }
 0x41f   :  { %v1504_v21 = vmax.f32 %v1503_v20, 0.0 }
 0x421   :  { %v1521_v22 = vpack.c.bf16 %v1504_v21, %v1504_v21 }
 0x423   :  { %2017 = vmatmul.mubr.bf16.vlgmr.msra.gmra.mrb[12].mxu1 %v1521_v22 }
 0x424   :  { %2036 = vmatprep.mubr.msk.bf16.mxu1 %vm2440_vm1, %v2439_v1  ;;  %2021 = vmatpush3.bf16.msra.mxu1 %v2291_v23 }
 0x425   :  { %2022 = vmatprep.subr.bf16.mxu1 %v2439_v1 }
 0x428   :  { %2023 = vmatpush3.bf16.msra.mxu1 %v2292_v24 }
 0x429   :  { %2024 = vmatprep.subr.bf16.mxu1 %v2439_v1 }
 0x42c   :  { %2025 = vmatpush3.bf16.msra.mxu1 %v2293_v25 }
 0x42d   :  { %2026 = vmatprep.subr.bf16.mxu1 %v2439_v1 }
 0x430   :  { %2027 = vmatpush3.bf16.msra.mxu1 %v2294_v26 }
 0x431   :  { %2028 = vmatprep.subr.bf16.mxu1 %v2439_v1 }
 0x434   :  { %2029 = vmatpush3.bf16.msra.mxu1 %v2295_v27 }
 0x435   :  { %2030 = vmatprep.subr.bf16.mxu1 %v2439_v1 }
 0x438   :  { %2031 = vmatpush3.bf16.msra.mxu1 %v2296_v28 }
 0x439   :  { %2032 = vmatprep.subr.bf16.mxu1 %v2439_v1 }
 0x43c   :  { %2033 = vmatpush3.bf16.msra.mxu1 %v2297_v29 }
 0x43d   :  { %2034 = vmatprep.subr.bf16.mxu1 %v2439_v1 }
 0x440   :  { %2035 = vmatpush3.bf16.msra.mxu1 %v2298_v30 }
 0x4f6   :  { %v1604_v31 = vpop.f32.mrb[12].mxu1 }
 0x4f7   :  { %v1612_v32 = vsel %vm1061_vm0, %v1604_v31, 0.0  ;;  %v1620_v33 = vmul.f32 %v1604_v31, %v1604_v31  ;;  %v2018_v34 = vpop.f32.mrb[13].mxu1 }
 0x4f8   :  { %v1613_v35 = vrot.slane %v1612_v32, 4  ;;  %v1607_v36 = vpop.f32.mrb[14].mxu1 }
 0x4f9   :  { %v1621_v37 = vsel %vm1061_vm0, %v1620_v33, 0.0  ;;  %v2019_v38 = vpop.f32.mrb[15].mxu1 }
 0x4fa   :  { %v1614_v39 = vadd.f32 %v1613_v35, %v1612_v32  ;;  %v1622_v40 = vrot.slane %v1621_v37, 4 }
 0x4fc   :  { %v1615_v41 = vrot.slane %v1614_v39, 2  ;;  %v1623_v42 = vadd.f32 %v1622_v40, %v1621_v37 }
 0x4fe   :  { %v1616_v43 = vadd.f32 %v1615_v41, %v1614_v39  ;;  %v1624_v44 = vrot.slane %v1623_v42, 2 }
 0x500   :  { %v1617_v45 = vrot.slane %v1616_v43, 1  ;;  %v1625_v1 = vadd.f32 %v1624_v44, %v1623_v42 }
 0x502   :  { %v1618_v47 = vadd.f32 %v1617_v45, %v1616_v43  ;;  %v1626_v48 = vrot.slane %v1625_v1, 1 }
 0x504   :  { %v1619_v49 = vmul.f32 0.5, %v1618_v47  ;;  %v1627_v51 = vadd.f32 %v1626_v48, %v1625_v1 }
 0x506   :  { %v1628_v54 = vmul.f32 0.5, %v1627_v51  ;;  %v1629_v53 = vmul.f32 %v1619_v49, %v1619_v49 }
 0x508   :  { %v1630_v56 = vsub.f32 %v1628_v54, %v1629_v53 }
 0x50a   :  { %v1631_v57 = vadd.f32 0.001, %v1630_v56 }
 0x50c   :  { %2307 = vrsqrt.f32 %v1631_v57 }
 0x516   :  { %v2308_v59 = vpop.eup %2307 }
 0x517   :  { %v1633_v60 = vmul.f32 %v2308_v59, %v1610_v58 }
 0x519   :  { %v1635_v61 = vmul.f32 %v1633_v60, %v1619_v49  ;;  %v1634_v62 = vmul.f32 %v1633_v60, %v1604_v31 }
 0x51b   :  { %v1636_v18 = vsub.f32 %v1611_v46, %v1635_v61 }
 0x51d   :  { %v1637_v63 = vadd.f32 %v1636_v18, %v1634_v62 }
 0x51f   :  { %v1638_v15 = vmax.f32 %v1637_v63, 0.0 }
 0x521   :  { %v1639_v0 = vpack.c.bf16 %v1638_v15, %v1638_v15 }
 0x523   :  { %2037 = vmatmul.mubr.bf16.vlgmr.msra.gmra.mrb[16].mxu1 %v1639_v0 }
 0x5f6   :  { %v1739_v52 = vpop.f32.mrb[16].mxu1 }
 0x5f7   :  { %v1740_v2 = vadd.f32 %v1739_v52, %v1656_v55  ;;  %v2038_v3 = vpop.f32.mrb[17].mxu1 }
 0x5f8   :  { %v1742_v50 = vpop.f32.mrb[18].mxu1 }
 0x5f9   :  { %1745 = vst [vmem:[#allocation10] sm:$0x3] %v1740_v2  ;;  %v2039_v4 = vpop.f32.mrb[19].mxu1 }
 0x5fa   :  { %2408 = shalt.err (!%p2405_p8)
}
 0x5fb   :  { %s2409_s17 = scalar_lea.hbm %s2618_s4, 32 }
 0x5fc   :  { %p2410_p9 = scmp.ne.s32.totalorder %s2618_s4, %s2409_s17  ;;  %p2413_p10 = scmp.lt.u32.totalorder %s2409_s17, %s2618_s4 }
 0x5fe   :  { %p2415_p11 = pnand %p2413_p10, %p2410_p9 }
 0x600   :  { %2418 = shalt.err (!%p2415_p11)
}
 0x601   :  { %1755 = dma.vmem_to_hbm [thread:$0]  %s1753_s1, 32, %s2618_s4, [#allocation4]  }
 0x602   :  { %2425 = dma.done.wait [#allocation4], 32  }
 0x603   :  { %2426 = vsyncadd [#allocation4], 4294967264 }
 0x604   :  { %1759 = vsyncpa [#allocation3], 1 }
 0x605   :  { %1760 = vsyncpa [#allocation6], 1 }
 0x606   :  { %1761 = vsyncpa [#allocation9], 1 }
 0x607   :  { %1762 = vsyncpa [#allocation4], 1 }

</bundles_post_ra>
